<compile_context>
chip_gen: v6e
topology: v6e:2x2x1
jax: 0.10.0
libtpu: 0.0.40
codegen_flags: <defaults>
</compile_context>

<pallas_src>
import functools

import jax
import jax.numpy as jnp
from jax.experimental import pallas as pl
from jax.experimental.pallas import tpu as pltpu


def _calibration_kernel(x_ref, o_ref, *, scaling, offset):
    # scaling = -(sigmoid_a * slope), offset = -(sigmoid_a * intercept + sigmoid_b)
    # so sigmoid(-(a*slope*x + a*intercept + b)) == sigmoid(scaling*x + offset).
    # jax.nn.sigmoid keeps exact-parity, numerically-stable semantics vs. torch.
    # TODO(synk): if a v7x bundle dump shows the EUP slot saturating, swap to an
    # exp + pl.reciprocal(approx=True) epilogue.
    o_ref[...] = jax.nn.sigmoid(scaling * x_ref[...] + offset)


def sklearn_prediction_calibration(x, slope, intercept, sigmoid_a, sigmoid_b,
                                   *, block_rows=512, block_cols=1024):
    """Elementwise calibrated-sigmoid over an arbitrarily shaped float array.

    block_rows must be a multiple of 8, block_cols a multiple of 128.
    Defaults give a 2 MiB f32 tile (lane-dense), good on v5e/v6e/v7x.
    """
    assert block_rows % 8 == 0 and block_cols % 128 == 0

    # Fold all constants (including the leading negation) at trace time.
    scaling = float(-(sigmoid_a * slope))
    offset = float(-(sigmoid_a * intercept + sigmoid_b))

    orig_shape = x.shape
    n = x.size

    # Flatten to a lane-dense 2-D slab: width = block_cols (multiple of 128).
    cols = block_cols
    rows = pl.cdiv(n, cols)
    rows = pl.cdiv(rows, 8) * 8                 # sublane granularity
    br = min(block_rows, rows)                  # don't over-tile tiny inputs
    rows_padded = pl.cdiv(rows, br) * br        # whole number of row-tiles
    padded_n = rows_padded * cols

    x_flat = x.reshape(-1)
    if padded_n != n:
        x_flat = jnp.pad(x_flat, (0, padded_n - n))
    x2d = x_flat.reshape(rows_padded, cols)

    grid = (rows_padded // br,)

    out2d = pl.pallas_call(
        functools.partial(_calibration_kernel, scaling=scaling, offset=offset),
        out_shape=jax.ShapeDtypeStruct((rows_padded, cols), x.dtype),
        grid=grid,
        in_specs=[pl.BlockSpec((br, cols), lambda i: (i, 0))],
        out_specs=pl.BlockSpec((br, cols), lambda i: (i, 0)),
        compiler_params=pltpu.CompilerParams(
            dimension_semantics=("parallel",),
        ),
    )(x2d)

    return out2d.reshape(-1)[:n].reshape(orig_shape)


if __name__ == "__main__":
    # Deterministic "pre-determined sklearn" parameters (synthetic).
    slope = 1.7
    intercept = -0.3
    sigmoid_a = -2.1
    sigmoid_b = 0.45

    key = jax.random.PRNGKey(0)
    # Small prediction-score matrix: 16 samples x 128 scores per sample.
    x = jax.random.normal(key, (16, 128), dtype=jnp.float32)

    out = sklearn_prediction_calibration(x, slope, intercept, sigmoid_a, sigmoid_b)
    out = jax.block_until_ready(out)

    # Reference check in plain JAX (mirrors the PyTorch forward exactly).
    scaling_ref = sigmoid_a * slope
    offset_ref = sigmoid_a * intercept + sigmoid_b
    ref = jax.nn.sigmoid(-(scaling_ref * x + offset_ref))
    assert out.shape == x.shape and out.dtype == x.dtype
    assert jnp.max(jnp.abs(out - ref)) < 1e-6

    print("KERNEL_OK")
</pallas_src>

<mosaic_0001>
module attributes {stable_mosaic.version = 11 : i64} {
  func.func @_calibration_kernel(%arg0: i32, %arg1: memref<8x1024xf32, #tpu.memory_space<vmem>>, %arg2: memref<8x1024xf32, #tpu.memory_space<vmem>>) attributes {dimension_semantics = [#tpu.dimension_semantics<parallel>], iteration_bounds = array<i64: 1>, scalar_prefetch = 0 : i64, scratch_operands = 0 : i64, tpu.core_type = #tpu.core_type<tc>, window_params = [{transform_indices = @transform_0, window_bounds = array<i64: 8, 1024>}, {transform_indices = @transform_1, window_bounds = array<i64: 8, 1024>}]} {
    %c0 = arith.constant 0 : index
    %c0_0 = arith.constant 0 : index
    %0 = vector.load %arg1[%c0, %c0_0] : memref<8x1024xf32, #tpu.memory_space<vmem>>, vector<8x1024xf32>
    %cst = arith.constant 3.570000e+00 : f32
    %1 = vector.broadcast %cst : f32 to vector<8x1024xf32>
    %2 = arith.mulf %1, %0 : vector<8x1024xf32>
    %cst_1 = arith.constant -1.080000e+00 : f32
    %3 = vector.broadcast %cst_1 : f32 to vector<8x1024xf32>
    %4 = arith.addf %2, %3 : vector<8x1024xf32>
    %5 = arith.negf %4 : vector<8x1024xf32>
    %6 = math.exp %5 : vector<8x1024xf32>
    %cst_2 = arith.constant 1.000000e+00 : f32
    %7 = vector.broadcast %cst_2 : f32 to vector<8x1024xf32>
    %8 = arith.addf %7, %6 : vector<8x1024xf32>
    %9 = arith.divf %7, %8 : vector<8x1024xf32>
    %c0_3 = arith.constant 0 : index
    %c0_4 = arith.constant 0 : index
    %10 = vector.load %arg2[%c0_3, %c0_4] : memref<8x1024xf32, #tpu.memory_space<vmem>>, vector<8x1024xf32>
    tpu.vector_store %arg2[%c0_3, %c0_4], %9 {strides = array<i32>} : memref<8x1024xf32, #tpu.memory_space<vmem>>, vector<8x1024xf32>,
    return
  }
  func.func @transform_0(%arg0: i32) -> (i32, i32) {
    %c0_i32 = arith.constant 0 : i32
    %c0_i32_0 = arith.constant 0 : i32
    return %arg0, %c0_i32 : i32, i32
  }
  func.func @transform_1(%arg0: i32) -> (i32, i32) {
    %c0_i32 = arith.constant 0 : i32
    %c0_i32_0 = arith.constant 0 : i32
    return %arg0, %c0_i32 : i32, i32
  }
}

</mosaic_0001>

<bundles_post_ra>
// kernel: tpu_custom_call.1
= control target key start
LH: loop header
LB: loop body
LE: loop exit
PB: predicated region body
PF: predicated region fallthrough
CT: control target
= control target key end

     0   :  { %6 = vsyncpa [#allocation3], 0  ;;  %s220_s0 = inlined_call_operand.hbm [shape: f32[8,1024], index: 0, kind: input, shape index: {}]   ;;  %s221_s1 = inlined_call_operand.hbm [shape: f32[8,1024], index: 1, kind: output, shape index: {}]  }
   0x1   :  { %7 = vsyncpa [#allocation4], 0  ;;  %s202_s6 = smov [#allocation2]  }
   0x2   :  { %s14_s7 = sshll.u32 %s202_s6, 4  ;;  %s15_s7 = int_to_ptr.vmem [resolvable:$true] %s14_s7 }
   0x3   :  { %s166_s8 = scalar_lea.vmem %s15_s7, 1024  ;;  %p171_p1 = scmp.lt.s32.totalorder %s15_s7, %s15_s7 }
   0x4   :  { %p167_p0 = scmp.ne.s32.totalorder %s15_s7, %s166_s8  ;;  %p172_p2 = scmp.lt.s32.totalorder %s166_s8, %s166_s8 }
   0x6   :  { %p173_p3 = por %p172_p2, %p171_p1 }
   0x8   :  { %p174_p4 = pnand %p173_p3, %p167_p0 }
   0xa   :  { %177 = shalt.err (!%p174_p4)
}
   0xb   :  { %17 = dma.hbm_to_vmem [thread:$0]  %s220_s0, 1024, %s15_s7, [#allocation3]  }
   0xc   :  { %198 = dma.done.wait [#allocation3], 1024  }
   0xd   :  { %199 = vsyncadd [#allocation3], 4294966272  ;;  %v21_v0 = vld [vmem:[#allocation2] sm:$0xff]  ;;  %v22_v1 = vld [vmem:[#allocation2 + $0x8] sm:$0xff]  ;;  %s203_s0 = smov [#allocation5]  }
   0xe   :  { %v23_v2 = vld [vmem:[#allocation2 + $0x10] sm:$0xff]  ;;  %v29_v3 = vmul.f32 3.57, %v21_v0  ;;  %v30_v4 = vmul.f32 3.57, %v22_v1  ;;  %v24_v6 = vld [vmem:[#allocation2 + $0x18] sm:$0xff] }
   0xf   :  { %v31_v5 = vmul.f32 3.57, %v23_v2  ;;  %v25_v7 = vld [vmem:[#allocation2 + $0x20] sm:$0xff]  ;;  %v26_v8 = vld [vmem:[#allocation2 + $0x28] sm:$0xff]  ;;  %v32_v12 = vmul.f32 3.57, %v24_v6 }
  0x10   :  { %v37_v9 = vadd.f32 -1.08, %v29_v3  ;;  %v38_v10 = vadd.f32 -1.08, %v30_v4  ;;  %v33_v13 = vmul.f32 3.57, %v25_v7 }
  0x11   :  { %v39_v11 = vadd.f32 -1.08, %v31_v5  ;;  %v34_v14 = vmul.f32 3.57, %v26_v8  ;;  %v40_v18 = vadd.f32 -1.08, %v32_v12 }
  0x12   :  { %v116_v15 = vmul.f32 -1.442695, %v37_v9  ;;  %v117_v16 = vmul.f32 -1.442695, %v38_v10  ;;  %v41_v19 = vadd.f32 -1.08, %v33_v13 }
  0x13   :  { %v118_v17 = vmul.f32 -1.442695, %v39_v11  ;;  %v42_v20 = vadd.f32 -1.08, %v34_v14  ;;  %v27_v21 = vld [vmem:[#allocation2 + $0x30] sm:$0xff]  ;;  %v28_v22 = vld [vmem:[#allocation2 + $0x38] sm:$0xff] }
  0x14   :  { %126 = vpow2.f32 %v116_v15  ;;  %v119_v23 = vmul.f32 -1.442695, %v40_v18  ;;  %v120_v24 = vmul.f32 -1.442695, %v41_v19  ;;  %v35_v26 = vmul.f32 3.57, %v27_v21 }
  0x15   :  { %128 = vpow2.f32 %v117_v16  ;;  %v121_v25 = vmul.f32 -1.442695, %v42_v20  ;;  %v36_v27 = vmul.f32 3.57, %v28_v22  ;;  %s107_s11 = sshll.u32 %s203_s0, 4  ;;  %s108_s11 = int_to_ptr.vmem [resolvable:$true] %s107_s11 }
  0x16   :  { %130 = vpow2.f32 %v118_v17  ;;  %v43_v28 = vadd.f32 -1.08, %v35_v26  ;;  %s178_s12 = scalar_lea.vmem %s108_s11, 1024  ;;  %p183_p6 = scmp.lt.s32.totalorder %s108_s11, %s108_s11 }
  0x17   :  { %132 = vpow2.f32 %v119_v23  ;;  %v44_v29 = vadd.f32 -1.08, %v36_v27  ;;  %p179_p5 = scmp.ne.s32.totalorder %s108_s11, %s178_s12  ;;  %p184_p7 = scmp.lt.s32.totalorder %s178_s12, %s178_s12 }
  0x18   :  { %134 = vpow2.f32 %v120_v24  ;;  %v122_v30 = vmul.f32 -1.442695, %v43_v28 }
  0x19   :  { %136 = vpow2.f32 %v121_v25  ;;  %v123_v31 = vmul.f32 -1.442695, %v44_v29  ;;  %p185_p8 = por %p184_p7, %p183_p6 }
  0x1a   :  { %138 = vpow2.f32 %v122_v30 }
  0x1b   :  { %140 = vpow2.f32 %v123_v31  ;;  %p186_p9 = pnand %p185_p8, %p179_p5 }
  0x21   :  { %v127_v32 = vpop.eup %126 }
  0x22   :  { %v129_v33 = vpop.eup %128  ;;  %v69_v34 = vadd.f32 1.0, %v127_v32 }
  0x23   :  { %v131_v35 = vpop.eup %130  ;;  %v70_v36 = vadd.f32 1.0, %v129_v33 }
  0x24   :  { %v133_v37 = vpop.eup %132  ;;  %142 = vrcp.f32 %v69_v34  ;;  %v71_v38 = vadd.f32 1.0, %v131_v35 }
  0x25   :  { %v135_v39 = vpop.eup %134  ;;  %144 = vrcp.f32 %v70_v36  ;;  %v72_v40 = vadd.f32 1.0, %v133_v37 }
  0x26   :  { %v137_v41 = vpop.eup %136  ;;  %146 = vrcp.f32 %v71_v38  ;;  %v73_v42 = vadd.f32 1.0, %v135_v39 }
  0x27   :  { %148 = vrcp.f32 %v72_v40  ;;  %v74_v43 = vadd.f32 1.0, %v137_v41  ;;  %v139_v44 = vpop.eup %138 }
  0x28   :  { %150 = vrcp.f32 %v73_v42  ;;  %v141_v45 = vpop.eup %140  ;;  %v75_v46 = vadd.f32 1.0, %v139_v44 }
  0x29   :  { %152 = vrcp.f32 %v74_v43  ;;  %v76_v47 = vadd.f32 1.0, %v141_v45 }
  0x2a   :  { %154 = vrcp.f32 %v75_v46 }
  0x2b   :  { %156 = vrcp.f32 %v76_v47 }
  0x31   :  { %v143_v48 = vpop.eup %142 }
  0x32   :  { %v145_v49 = vpop.eup %144  ;;  %93 = vst [vmem:[#allocation5] sm:$0xff] %v143_v48 }
  0x33   :  { %v147_v50 = vpop.eup %146  ;;  %94 = vst [vmem:[#allocation5 + $0x8] sm:$0xff] %v145_v49 }
  0x34   :  { %v149_v51 = vpop.eup %148  ;;  %95 = vst [vmem:[#allocation5 + $0x10] sm:$0xff] %v147_v50 }
  0x35   :  { %v151_v52 = vpop.eup %150  ;;  %96 = vst [vmem:[#allocation5 + $0x18] sm:$0xff] %v149_v51 }
  0x36   :  { %v153_v53 = vpop.eup %152  ;;  %97 = vst [vmem:[#allocation5 + $0x20] sm:$0xff] %v151_v52 }
  0x37   :  { %98 = vst [vmem:[#allocation5 + $0x28] sm:$0xff] %v153_v53  ;;  %v155_v54 = vpop.eup %154 }
  0x38   :  { %v157_v55 = vpop.eup %156  ;;  %99 = vst [vmem:[#allocation5 + $0x30] sm:$0xff] %v155_v54 }
  0x39   :  { %100 = vst [vmem:[#allocation5 + $0x38] sm:$0xff] %v157_v55 }
  0x3a   :  { %189 = shalt.err (!%p186_p9)
}
  0x3b   :  { %110 = dma.vmem_to_hbm [thread:$0]  %s108_s11, 1024, %s221_s1, [#allocation4]  }
  0x3c   :  { %200 = dma.done.wait [#allocation4], 1024  }
  0x3d   :  { %201 = vsyncadd [#allocation4], 4294966272 }
  0x3e   :  { %114 = vsyncpa [#allocation3], 1 }
  0x3f   :  { %115 = vsyncpa [#allocation4], 1 }

</bundles_post_ra>
